<compile_context>
chip_gen: v6e
topology: v6e:2x2x1
jax: 0.10.0
libtpu: 0.0.40
codegen_flags: <defaults>
</compile_context>

<pallas_src>
import functools

import jax
import jax.numpy as jnp
from jax.experimental import pallas as pl
from jax.experimental.pallas import tpu as pltpu

_LANE = 128    # last-dim tile (lanes)
_SUBLANE = 8   # second-to-last-dim tile for f32 (sublanes)


def _round_up(x, m):
    return (x + m - 1) // m * m


def _fused_mlp_kernel(x_ref, w_ref, b_ref, out_ref):
    """One fused affine layer per batch tile: out = x @ W_fused + b_fused."""
    x = x_ref[...]
    w = w_ref[...]
    if x.dtype != w.dtype:           # low-precision weight packing path
        x = x.astype(w.dtype)
    acc = jnp.dot(x, w, preferred_element_type=jnp.float32)
    out_ref[...] = (acc + b_ref[...]).astype(out_ref.dtype)


def pack_params(hidden_params, out_params, dtype=None):
    """One-time repack: fold the activation-free Linear chain into a single
    (in_features, padded_classes) weight and a (1, padded_classes) f32 bias.

    hidden_params: list of (W, b) with W of shape (out_features, in_features)
                   (PyTorch nn.Linear convention).
    out_params:    (W_out, b_out) for the classification head.
    Returns (w_packed, b_packed, num_classes).
    """
    prec = jax.lax.Precision.HIGHEST   # fuse exactly in f32
    layers = list(hidden_params) + [out_params]

    w0, b0 = layers[0]
    w = jnp.asarray(w0, jnp.float32).T                       # (in, out)
    b = jnp.asarray(b0, jnp.float32).reshape(1, -1)
    for wi, bi in layers[1:]:
        wi_t = jnp.asarray(wi, jnp.float32).T                # (in, out)
        bi_r = jnp.asarray(bi, jnp.float32).reshape(1, -1)
        w = jnp.dot(w, wi_t, precision=prec)
        b = jnp.dot(b, wi_t, precision=prec) + bi_r

    in_f, n_cls = w.shape
    cls_pad = _round_up(n_cls, _LANE)                        # lane-dense output
    w_dtype = jnp.float32 if dtype is None else dtype

    w_packed = jnp.zeros((in_f, cls_pad), w_dtype)
    w_packed = w_packed.at[:, :n_cls].set(w.astype(w_dtype))
    b_packed = jnp.zeros((1, cls_pad), jnp.float32)
    b_packed = b_packed.at[:, :n_cls].set(b)
    return w_packed, b_packed, n_cls


@functools.partial(jax.jit, static_argnames=("num_classes", "block_batch"))
def mlp_classifier_forward(x, w_packed, b_packed, *, num_classes,
                           block_batch=1024):
    """MLPClassifier forward (eval mode) as a single batch-tiled Pallas kernel."""
    batch, in_f = x.shape
    k_dim, cls_pad = w_packed.shape
    assert k_dim == in_f, "packed weight does not match input feature size"

    # Pad the batch only to a sublane multiple (<= 7 wasted rows).
    padded_batch = _round_up(batch, _SUBLANE)
    if padded_batch != batch:
        x = jnp.pad(x, ((0, padded_batch - batch), (0, 0)))

    # Batch tile: sublane-aligned, at most block_batch rows, clamped to the batch.
    tb = min(max(_SUBLANE, _round_up(block_batch, _SUBLANE)), padded_batch)
    # v7x megacore: when the batch is large enough, make sure the "parallel"
    # grid axis has >= 2 steps so both TensorCores get work.
    if tb >= padded_batch and padded_batch >= 2 * 128:
        tb = _round_up(pl.cdiv(padded_batch, 2), _SUBLANE)
    grid = (pl.cdiv(padded_batch, tb),)

    itemsize = jnp.dtype(x.dtype).itemsize
    w_bytes = w_packed.size * jnp.dtype(w_packed.dtype).itemsize
    b_bytes = b_packed.size * jnp.dtype(b_packed.dtype).itemsize
    cost = pl.CostEstimate(
        flops=2 * padded_batch * in_f * cls_pad,
        transcendentals=0,
        bytes_accessed=(padded_batch * in_f * itemsize      # x
                        + w_bytes + b_bytes                  # resident params
                        + padded_batch * cls_pad * itemsize))  # out

    # VMEM budget: double-buffered x/out tiles + resident (double-buffered)
    # weight/bias + slack; clamp to 48 MiB (fits v7x's 64 MiB physical VMEM).
    tile_bytes = tb * (in_f + cls_pad) * itemsize
    vmem_bytes = int(min(48 * 1024 * 1024,
                         max(16 * 1024 * 1024,
                             4 * tile_bytes + 2 * (w_bytes + b_bytes) + (1 << 20))))

    out_pad = pl.pallas_call(
        _fused_mlp_kernel,
        out_shape=jax.ShapeDtypeStruct((padded_batch, cls_pad), x.dtype),
        grid=grid,
        in_specs=[
            # Activations: batch-tiled, feature dim left at full (unpadded) size.
            pl.BlockSpec((tb, in_f), lambda i: (i, 0)),
            # Fused weight / bias: constant index_map -> VMEM-resident.
            pl.BlockSpec((in_f, cls_pad), lambda i: (0, 0)),
            pl.BlockSpec((1, cls_pad), lambda i: (0, 0)),
        ],
        out_specs=pl.BlockSpec((tb, cls_pad), lambda i: (i, 0)),
        compiler_params=pltpu.CompilerParams(
            dimension_semantics=("parallel",),
            vmem_limit_bytes=vmem_bytes),
        cost_estimate=cost,
    )(x, w_packed, b_packed)

    return out_pad[:batch, :num_classes]


def init_linear(key, in_features, out_features, dtype=jnp.float32):
    """Deterministic PyTorch-style Linear init: U(-1/sqrt(in), 1/sqrt(in))."""
    kw, kb = jax.random.split(key)
    bound = 1.0 / jnp.sqrt(jnp.asarray(in_features, dtype))
    w = jax.random.uniform(kw, (out_features, in_features), dtype,
                           minval=-bound, maxval=bound)
    b = jax.random.uniform(kb, (out_features,), dtype,
                           minval=-bound, maxval=bound)
    return w, b


def reference_forward(x, hidden_params, out_params):
    """Pure-JAX reference of the PyTorch forward (eval mode: dropout=identity)."""
    prec = jax.lax.Precision.HIGHEST
    h = x
    for w, b in hidden_params:
        h = jnp.dot(h, w.T, precision=prec) + b
    w_o, b_o = out_params
    return jnp.dot(h, w_o.T, precision=prec) + b_o


if __name__ == "__main__":
    # Module hyperparameters (small, consistent with the PyTorch __init__).
    input_size = 8             # latent embedding size fed to the classifier
    hidden_size = 32
    num_classes = 4
    latent_size = 8            # unused by the module's forward
    num_classifier_layers = 3  # -> 2 hidden Linear layers + output head
    dropout_p = 0.2            # eval-mode identity
    batch = 2

    key = jax.random.PRNGKey(0)
    keys = jax.random.split(key, num_classifier_layers + 2)

    # hidden: Linear(input_size, hidden_size) then
    #         Linear(hidden_size, hidden_size) x (num_classifier_layers - 2)
    hidden_params = [init_linear(keys[0], input_size, hidden_size)]
    for i in range(1, num_classifier_layers - 1):
        hidden_params.append(init_linear(keys[i], hidden_size, hidden_size))
    out_params = init_linear(keys[num_classifier_layers - 1],
                             hidden_size, num_classes)

    x = jax.random.normal(keys[-1], (batch, input_size), jnp.float32)

    # Parameter fusion + layout is done once, outside the per-call path.
    w_packed, b_packed, n_cls = pack_params(hidden_params, out_params)

    out = mlp_classifier_forward(x, w_packed, b_packed, num_classes=n_cls)
    out = jax.block_until_ready(out)

    ref = reference_forward(x, hidden_params, out_params)
    assert out.shape == (batch, num_classes)
    # 2e-3 tolerance covers MXU f32 pass-decomposition differences vs the XLA
    # HIGHEST-precision layer-by-layer reference; genuine layout/transpose/bias
    # bugs produce errors O(0.1) or larger.
    assert jnp.allclose(out, ref, atol=2e-3, rtol=2e-3), (
        "max abs err = %f" % float(jnp.max(jnp.abs(out - ref))))

    print("KERNEL_OK")
</pallas_src>

<mosaic_0001>
module attributes {stable_mosaic.version = 11 : i64} {
  func.func @_fused_mlp_kernel(%arg0: i32, %arg1: memref<8x8xf32, #tpu.memory_space<vmem>>, %arg2: memref<8x128xf32, #tpu.memory_space<vmem>>, %arg3: memref<1x128xf32, #tpu.memory_space<vmem>>, %arg4: memref<8x128xf32, #tpu.memory_space<vmem>>) attributes {dimension_semantics = [#tpu.dimension_semantics<parallel>], iteration_bounds = array<i64: 1>, scalar_prefetch = 0 : i64, scratch_operands = 0 : i64, tpu.core_type = #tpu.core_type<tc>, window_params = [{transform_indices = @transform_0, window_bounds = array<i64: 8, 8>}, {pipeline_mode = #tpu.pipeline_mode<synchronous>, transform_indices = @transform_1, window_bounds = array<i64: 8, 128>}, {pipeline_mode = #tpu.pipeline_mode<synchronous>, transform_indices = @transform_2, window_bounds = array<i64: 1, 128>}, {transform_indices = @transform_3, window_bounds = array<i64: 8, 128>}]} {
    %c0 = arith.constant 0 : index
    %c0_0 = arith.constant 0 : index
    %0 = vector.load %arg1[%c0, %c0_0] : memref<8x8xf32, #tpu.memory_space<vmem>>, vector<8x8xf32>
    %c0_1 = arith.constant 0 : index
    %c0_2 = arith.constant 0 : index
    %1 = vector.load %arg2[%c0_1, %c0_2] : memref<8x128xf32, #tpu.memory_space<vmem>>, vector<8x128xf32>
    %cst = arith.constant dense<0.000000e+00> : vector<8x128xf32>
    %2 = tpu.matmul %0, %1, %cst {dimension_numbers = #tpu.dot_dimension_numbers<[1], [0], [0], [1], [0, 0, 1, 1], [], []>} : vector<8x8xf32>, vector<8x128xf32>, vector<8x128xf32> -> vector<8x128xf32>
    %c0_3 = arith.constant 0 : index
    %c0_4 = arith.constant 0 : index
    %3 = vector.load %arg3[%c0_3, %c0_4] : memref<1x128xf32, #tpu.memory_space<vmem>>, vector<1x128xf32>
    %4 = vector.broadcast %3 : vector<1x128xf32> to vector<8x128xf32>
    %5 = arith.addf %2, %4 : vector<8x128xf32>
    %c0_5 = arith.constant 0 : index
    %c0_6 = arith.constant 0 : index
    %6 = vector.load %arg4[%c0_5, %c0_6] : memref<8x128xf32, #tpu.memory_space<vmem>>, vector<8x128xf32>
    tpu.vector_store %arg4[%c0_5, %c0_6], %5 {strides = array<i32>} : memref<8x128xf32, #tpu.memory_space<vmem>>, vector<8x128xf32>,
    return
  }
  func.func @transform_0(%arg0: i32) -> (i32, i32) {
    %c0_i32 = arith.constant 0 : i32
    %c0_i32_0 = arith.constant 0 : i32
    return %arg0, %c0_i32 : i32, i32
  }
  func.func @transform_1(%arg0: i32) -> (i32, i32) {
    %c0_i32 = arith.constant 0 : i32
    %c0_i32_0 = arith.constant 0 : i32
    %c0_i32_1 = arith.constant 0 : i32
    return %c0_i32, %c0_i32_0 : i32, i32
  }
  func.func @transform_2(%arg0: i32) -> (i32, i32) {
    %c0_i32 = arith.constant 0 : i32
    %c0_i32_0 = arith.constant 0 : i32
    %c0_i32_1 = arith.constant 0 : i32
    return %c0_i32, %c0_i32_0 : i32, i32
  }
  func.func @transform_3(%arg0: i32) -> (i32, i32) {
    %c0_i32 = arith.constant 0 : i32
    %c0_i32_0 = arith.constant 0 : i32
    return %arg0, %c0_i32 : i32, i32
  }
}

</mosaic_0001>

<bundles_post_ra>
// kernel: mlp_classifier_forward.1
= control target key start
LH: loop header
LB: loop body
LE: loop exit
PB: predicated region body
PF: predicated region fallthrough
CT: control target
= control target key end

     0   :  { %vm23_vm0 = vcmask 64512   ;;  %v113_v0 = vmov 0.0   ;;  %vm114_vm1 = vmmov 0   ;;  %s147_s1 = inlined_call_operand.vmem [shape: f32[8,128], index: 1, kind: input, shape index: {}]   ;;  %s148_s0 = inlined_call_operand.vmem [shape: f32[8,8], index: 0, kind: input, shape index: {}]   ;;  %s149_s2 = inlined_call_operand.vmem [shape: f32[1,128], index: 2, kind: input, shape index: {}]   ;;  %s150_s3 = inlined_call_operand.vmem [shape: f32[8,128], index: 3, kind: output, shape index: {}]  }
   0x1   :  { %106 = vmatprep.subr.mxu0 %v113_v0  ;;  %v15_v1 = vld [vmem:[%s147_s1] sm:$0xff]  ;;  %108 = vmatprep.mubr.msk.f32.mxu0 %vm114_vm1, %v113_v0 }
   0x2   :  { %v14_v2 = vld [vmem:[%s148_s0] sm:$0xff]  ;;  %107 = vmatpush3.msra.mxu0 %v15_v1 }
   0x3   :  { %109 = vmatmul.mubr.msk.f32.vlgmr.msra.gmra.mxu0 %vm23_vm0, %v14_v2  ;;  %v102_v3 = vld [vmem:[%s149_s2] ss:$0 sm:$0xff] }
  0xc3   :  { %v93_v4 = vpop.f32.mrf.mxu0 }
  0xc4   :  { %v94_v5 = vadd.f32 %v102_v3, %v93_v4 }
  0xc5   :  { %v110_v6 = vpop.f32.mrf.mxu0 }
  0xc6   :  { %97 = vst [vmem:[%s150_s3] sm:$0xff] %v94_v5 }

</bundles_post_ra>
